<compile_context>
chip_gen: v7x
topology: tpu7x:2x2x1
jax: 0.10.0
libtpu: 0.0.40
codegen_flags: <defaults>
</compile_context>

<pallas_src>
import functools

import jax
import jax.numpy as jnp
from jax.experimental import pallas as pl
from jax.experimental.pallas import tpu as pltpu

_EPS = 1e-5
_D_IN = 63        # raw input feature dim (kept un-padded; cast in-kernel)
_D1 = 256
_D2 = 128
_D3_PAD = 128     # 64 -> 128 (zero rows/cols are inert through ReLU + matmul)


def _mlp_kernel(x_ref,
                w1_ref, t1_ref,
                w2_ref, t2_ref,
                w3_ref, t3_ref,
                w4_ref, b4_ref,
                o_ref):
    # Layer 1: cast x f32->bf16 in-kernel (VPU slots are otherwise idle),
    # bf16 MXU matmul (BN scale pre-folded into W), f32 accumulate,
    # then shift + ReLU in f32.
    h = jnp.dot(x_ref[...].astype(jnp.bfloat16), w1_ref[...],
                preferred_element_type=jnp.float32)
    h = jnp.maximum(h + t1_ref[...], 0.0)
    # Layer 2
    h = jnp.dot(h.astype(jnp.bfloat16), w2_ref[...],
                preferred_element_type=jnp.float32)
    h = jnp.maximum(h + t2_ref[...], 0.0)
    # Layer 3
    h = jnp.dot(h.astype(jnp.bfloat16), w3_ref[...],
                preferred_element_type=jnp.float32)
    h = jnp.maximum(h + t3_ref[...], 0.0)
    # Layer 4 (logits, no activation); bf16 writeback halves output HBM traffic.
    h = jnp.dot(h.astype(jnp.bfloat16), w4_ref[...],
                preferred_element_type=jnp.float32)
    o_ref[...] = (h + b4_ref[...]).astype(o_ref.dtype)


def _pad_to(x, rows, cols):
    r, c = x.shape
    return jnp.pad(x, ((0, rows - r), (0, cols - c)))


def _pad_row(x, cols):
    return jnp.pad(x.reshape(1, -1), ((0, 0), (0, cols - x.shape[0])))


def prepare_params(params, num_classes):
    """One-time prep (outside the hot path): fold BN into weight columns and a
    per-feature shift, transpose, zero-pad intermediate feature dims to 128,
    and cast matmul operands to bf16."""
    def fold(W, b, gamma, beta, mean, var, in_pad, out_pad):
        scale = gamma / jnp.sqrt(var + _EPS)
        Wt = W.T.astype(jnp.float32) * scale[None, :]        # fold scale into W
        shift = (b - mean) * scale + beta
        return (_pad_to(Wt, in_pad, out_pad).astype(jnp.bfloat16),
                _pad_row(shift.astype(jnp.float32), out_pad))

    nc_pad = max(128, ((num_classes + 127) // 128) * 128)

    W1, t1 = fold(params["fc1_w"], params["fc1_b"], params["bn1_g"],
                  params["bn1_b"], params["bn1_m"], params["bn1_v"],
                  _D_IN, _D1)
    W2, t2 = fold(params["fc2_w"], params["fc2_b"], params["bn2_g"],
                  params["bn2_b"], params["bn2_m"], params["bn2_v"],
                  _D1, _D2)
    W3, t3 = fold(params["fc3_w"], params["fc3_b"], params["bn3_g"],
                  params["bn3_b"], params["bn3_m"], params["bn3_v"],
                  _D2, _D3_PAD)
    W4 = _pad_to(params["fc4_w"].T.astype(jnp.float32),
                 _D3_PAD, nc_pad).astype(jnp.bfloat16)
    b4 = _pad_row(params["fc4_b"].astype(jnp.float32), nc_pad)
    return (W1, t1, W2, t2, W3, t3, W4, b4)


def _choose_batch_tile(B, batch_tile):
    """Pick (tb, b_pad) bounding tail padding and keeping >=2 grid steps for
    large batches (so the 'parallel' axis shards across both v7x TCs)."""
    steps = -(-B // batch_tile)                   # cdiv
    if steps < 2 and B >= 1024:
        steps = 2
    tb = max(8, ((-(-B // steps) + 7) // 8) * 8)  # multiple of 8 sublanes
    b_pad = tb * (-(-B // tb))
    return tb, b_pad


def hand_gesture_forward(x, prepared, num_classes, batch_tile=1024):
    """x: (B, 63) float32. Returns (B, num_classes) float32 logits
    (computed with bf16 matmuls / bf16 writeback; ~3 significant digits)."""
    W1, t1, W2, t2, W3, t3, W4, b4 = prepared
    nc_pad = W4.shape[1]
    B, Fin = x.shape
    assert Fin == _D_IN, Fin

    tb, b_pad = _choose_batch_tile(B, batch_tile)
    grid = (b_pad // tb,)

    x_in = x.astype(jnp.float32)
    if b_pad != B:                                # batch-only pad (cheap / no-op)
        x_in = jnp.pad(x_in, ((0, b_pad - B), (0, 0)))

    tiled = lambda r, c: pl.BlockSpec((r, c), lambda i: (i, 0))
    # Constant index_map => never re-DMA'd; single buffer saves VMEM (v7x).
    pinned = lambda r, c: pl.BlockSpec((r, c), lambda i: (0, 0),
                                       pipeline_mode=pl.Buffered(1))

    flops = 2 * b_pad * (_D_IN * _D1 + _D1 * _D2 + _D2 * _D3_PAD
                         + _D3_PAD * nc_pad)
    bytes_accessed = int(
        b_pad * _D_IN * 4 + b_pad * nc_pad * 2
        + sum(int(a.size) * a.dtype.itemsize
              for a in (W1, t1, W2, t2, W3, t3, W4, b4)))

    out = pl.pallas_call(
        _mlp_kernel,
        out_shape=jax.ShapeDtypeStruct((b_pad, nc_pad), jnp.bfloat16),
        grid=grid,
        in_specs=[
            tiled(tb, _D_IN),                              # x (blocked on batch)
            pinned(_D_IN, _D1),      pinned(1, _D1),       # layer 1 (VMEM-pinned)
            pinned(_D1, _D2),        pinned(1, _D2),       # layer 2
            pinned(_D2, _D3_PAD),    pinned(1, _D3_PAD),   # layer 3
            pinned(_D3_PAD, nc_pad), pinned(1, nc_pad),    # layer 4
        ],
        out_specs=tiled(tb, nc_pad),
        compiler_params=pltpu.CompilerParams(
            dimension_semantics=("parallel",),
            vmem_limit_bytes=32 * 1024 * 1024),
        cost_estimate=pl.CostEstimate(flops=flops, transcendentals=0,
                                      bytes_accessed=bytes_accessed),
    )(x_in, W1, t1, W2, t2, W3, t3, W4, b4)

    return out[:B, :num_classes].astype(jnp.float32)


def init_params(key, num_classes):
    """Deterministic parameter init (shapes match nn.Module __init__)."""
    ks = jax.random.split(key, 8)
    dims = [(256, 63), (128, 256), (64, 128), (num_classes, 64)]
    params = {}
    for i, (out_d, in_d) in enumerate(dims, start=1):
        bound = 1.0 / jnp.sqrt(in_d)
        params[f"fc{i}_w"] = jax.random.uniform(
            ks[2 * (i - 1)], (out_d, in_d), jnp.float32, -bound, bound)
        params[f"fc{i}_b"] = jax.random.uniform(
            ks[2 * (i - 1) + 1], (out_d,), jnp.float32, -bound, bound)
    # BatchNorm params (inference / eval mode): nontrivial running stats so
    # the BN math is actually exercised.
    bn_key = jax.random.split(key, 2)[1]
    for i, d in zip((1, 2, 3), (256, 128, 64)):
        k1, k2, bn_key = jax.random.split(bn_key, 3)
        params[f"bn{i}_g"] = jnp.ones((d,), jnp.float32)
        params[f"bn{i}_b"] = jnp.zeros((d,), jnp.float32)
        params[f"bn{i}_m"] = 0.1 * jax.random.normal(k1, (d,), jnp.float32)
        params[f"bn{i}_v"] = 1.0 + 0.1 * jax.random.uniform(k2, (d,), jnp.float32)
    return params


def reference_forward(x, params, num_classes):
    """Pure-JAX f32 reference for validation (eval mode: dropout = identity)."""
    h = x.astype(jnp.float32)
    for i, has_relu in zip((1, 2, 3, 4), (True, True, True, False)):
        h = h @ params[f"fc{i}_w"].T + params[f"fc{i}_b"]
        if has_relu:
            g, b = params[f"bn{i}_g"], params[f"bn{i}_b"]
            m, v = params[f"bn{i}_m"], params[f"bn{i}_v"]
            h = (h - m) / jnp.sqrt(v + _EPS) * g + b
            h = jnp.maximum(h, 0.0)
    return h


if __name__ == "__main__":
    num_classes = 10
    batch = 8

    key = jax.random.PRNGKey(0)
    k_params, k_x = jax.random.split(key)
    params = init_params(k_params, num_classes)
    x = jax.random.normal(k_x, (batch, 63), jnp.float32)

    # One-time parameter prep (BN fold + pad + transpose + bf16 cast).
    prepared = jax.tree.map(jax.block_until_ready,
                            prepare_params(params, num_classes))

    fwd = jax.jit(functools.partial(hand_gesture_forward,
                                    num_classes=num_classes))
    out = fwd(x, prepared)
    out = jax.block_until_ready(out)

    ref = reference_forward(x, params, num_classes)
    assert out.shape == (batch, num_classes), out.shape
    # bf16 matmul inputs + bf16 logit writeback with f32 accumulation ->
    # relaxed tolerance vs the f32 reference (fine for classification).
    assert jnp.allclose(out, ref, atol=7.5e-2, rtol=7.5e-2), \
        float(jnp.max(jnp.abs(out - ref)))

    print("KERNEL_OK")
</pallas_src>

<mosaic_0001>
module attributes {stable_mosaic.version = 11 : i64} {
  func.func @_mlp_kernel(%arg0: i32, %arg1: memref<8x63xf32, #tpu.memory_space<vmem>>, %arg2: memref<63x256xbf16, #tpu.memory_space<vmem>>, %arg3: memref<1x256xf32, #tpu.memory_space<vmem>>, %arg4: memref<256x128xbf16, #tpu.memory_space<vmem>>, %arg5: memref<1x128xf32, #tpu.memory_space<vmem>>, %arg6: memref<128x128xbf16, #tpu.memory_space<vmem>>, %arg7: memref<1x128xf32, #tpu.memory_space<vmem>>, %arg8: memref<128x128xbf16, #tpu.memory_space<vmem>>, %arg9: memref<1x128xf32, #tpu.memory_space<vmem>>, %arg10: memref<8x128xbf16, #tpu.memory_space<vmem>>) attributes {dimension_semantics = [#tpu.dimension_semantics<parallel>], iteration_bounds = array<i64: 1>, scalar_prefetch = 0 : i64, scratch_operands = 0 : i64, tpu.core_type = #tpu.core_type<tc>, window_params = [{transform_indices = @transform_0, window_bounds = array<i64: 8, 63>}, {pipeline_mode = #tpu.pipeline_mode<synchronous>, transform_indices = @transform_1, window_bounds = array<i64: 63, 256>}, {pipeline_mode = #tpu.pipeline_mode<synchronous>, transform_indices = @transform_2, window_bounds = array<i64: 1, 256>}, {pipeline_mode = #tpu.pipeline_mode<synchronous>, transform_indices = @transform_3, window_bounds = array<i64: 256, 128>}, {pipeline_mode = #tpu.pipeline_mode<synchronous>, transform_indices = @transform_4, window_bounds = array<i64: 1, 128>}, {pipeline_mode = #tpu.pipeline_mode<synchronous>, transform_indices = @transform_5, window_bounds = array<i64: 128, 128>}, {pipeline_mode = #tpu.pipeline_mode<synchronous>, transform_indices = @transform_6, window_bounds = array<i64: 1, 128>}, {pipeline_mode = #tpu.pipeline_mode<synchronous>, transform_indices = @transform_7, window_bounds = array<i64: 128, 128>}, {pipeline_mode = #tpu.pipeline_mode<synchronous>, transform_indices = @transform_8, window_bounds = array<i64: 1, 128>}, {transform_indices = @transform_9, window_bounds = array<i64: 8, 128>}]} {
    %c0 = arith.constant 0 : index
    %c0_0 = arith.constant 0 : index
    %0 = vector.load %arg1[%c0, %c0_0] : memref<8x63xf32, #tpu.memory_space<vmem>>, vector<8x63xf32>
    %1 = arith.truncf %0 : vector<8x63xf32> to vector<8x63xbf16>
    %c0_1 = arith.constant 0 : index
    %c0_2 = arith.constant 0 : index
    %2 = vector.load %arg2[%c0_1, %c0_2] : memref<63x256xbf16, #tpu.memory_space<vmem>>, vector<63x256xbf16>
    %cst = arith.constant dense<0.000000e+00> : vector<8x256xf32>
    %3 = tpu.matmul %1, %2, %cst {dimension_numbers = #tpu.dot_dimension_numbers<[1], [0], [0], [1], [0, 0, 1, 1], [], []>} : vector<8x63xbf16>, vector<63x256xbf16>, vector<8x256xf32> -> vector<8x256xf32>
    %c0_3 = arith.constant 0 : index
    %c0_4 = arith.constant 0 : index
    %4 = vector.load %arg3[%c0_3, %c0_4] : memref<1x256xf32, #tpu.memory_space<vmem>>, vector<1x256xf32>
    %5 = vector.broadcast %4 : vector<1x256xf32> to vector<8x256xf32>
    %6 = arith.addf %3, %5 : vector<8x256xf32>
    %cst_5 = arith.constant 0.000000e+00 : f32
    %7 = vector.broadcast %cst_5 : f32 to vector<8x256xf32>
    %8 = arith.maximumf %6, %7 : vector<8x256xf32>
    %9 = arith.truncf %8 : vector<8x256xf32> to vector<8x256xbf16>
    %c0_6 = arith.constant 0 : index
    %c0_7 = arith.constant 0 : index
    %10 = vector.load %arg4[%c0_6, %c0_7] : memref<256x128xbf16, #tpu.memory_space<vmem>>, vector<256x128xbf16>
    %cst_8 = arith.constant dense<0.000000e+00> : vector<8x128xf32>
    %11 = tpu.matmul %9, %10, %cst_8 {dimension_numbers = #tpu.dot_dimension_numbers<[1], [0], [0], [1], [0, 0, 1, 1], [], []>} : vector<8x256xbf16>, vector<256x128xbf16>, vector<8x128xf32> -> vector<8x128xf32>
    %c0_9 = arith.constant 0 : index
    %c0_10 = arith.constant 0 : index
    %12 = vector.load %arg5[%c0_9, %c0_10] : memref<1x128xf32, #tpu.memory_space<vmem>>, vector<1x128xf32>
    %13 = vector.broadcast %12 : vector<1x128xf32> to vector<8x128xf32>
    %14 = arith.addf %11, %13 : vector<8x128xf32>
    %cst_11 = arith.constant 0.000000e+00 : f32
    %15 = vector.broadcast %cst_11 : f32 to vector<8x128xf32>
    %16 = arith.maximumf %14, %15 : vector<8x128xf32>
    %17 = arith.truncf %16 : vector<8x128xf32> to vector<8x128xbf16>
    %c0_12 = arith.constant 0 : index
    %c0_13 = arith.constant 0 : index
    %18 = vector.load %arg6[%c0_12, %c0_13] : memref<128x128xbf16, #tpu.memory_space<vmem>>, vector<128x128xbf16>
    %cst_14 = arith.constant dense<0.000000e+00> : vector<8x128xf32>
    %19 = tpu.matmul %17, %18, %cst_14 {dimension_numbers = #tpu.dot_dimension_numbers<[1], [0], [0], [1], [0, 0, 1, 1], [], []>} : vector<8x128xbf16>, vector<128x128xbf16>, vector<8x128xf32> -> vector<8x128xf32>
    %c0_15 = arith.constant 0 : index
    %c0_16 = arith.constant 0 : index
    %20 = vector.load %arg7[%c0_15, %c0_16] : memref<1x128xf32, #tpu.memory_space<vmem>>, vector<1x128xf32>
    %21 = vector.broadcast %20 : vector<1x128xf32> to vector<8x128xf32>
    %22 = arith.addf %19, %21 : vector<8x128xf32>
    %cst_17 = arith.constant 0.000000e+00 : f32
    %23 = vector.broadcast %cst_17 : f32 to vector<8x128xf32>
    %24 = arith.maximumf %22, %23 : vector<8x128xf32>
    %25 = arith.truncf %24 : vector<8x128xf32> to vector<8x128xbf16>
    %c0_18 = arith.constant 0 : index
    %c0_19 = arith.constant 0 : index
    %26 = vector.load %arg8[%c0_18, %c0_19] : memref<128x128xbf16, #tpu.memory_space<vmem>>, vector<128x128xbf16>
    %cst_20 = arith.constant dense<0.000000e+00> : vector<8x128xf32>
    %27 = tpu.matmul %25, %26, %cst_20 {dimension_numbers = #tpu.dot_dimension_numbers<[1], [0], [0], [1], [0, 0, 1, 1], [], []>} : vector<8x128xbf16>, vector<128x128xbf16>, vector<8x128xf32> -> vector<8x128xf32>
    %c0_21 = arith.constant 0 : index
    %c0_22 = arith.constant 0 : index
    %28 = vector.load %arg9[%c0_21, %c0_22] : memref<1x128xf32, #tpu.memory_space<vmem>>, vector<1x128xf32>
    %29 = vector.broadcast %28 : vector<1x128xf32> to vector<8x128xf32>
    %30 = arith.addf %27, %29 : vector<8x128xf32>
    %31 = arith.truncf %30 : vector<8x128xf32> to vector<8x128xbf16>
    %c0_23 = arith.constant 0 : index
    %c0_24 = arith.constant 0 : index
    %32 = vector.load %arg10[%c0_23, %c0_24] : memref<8x128xbf16, #tpu.memory_space<vmem>>, vector<8x128xbf16>
    tpu.vector_store %arg10[%c0_23, %c0_24], %31 {strides = array<i32>} : memref<8x128xbf16, #tpu.memory_space<vmem>>, vector<8x128xbf16>,
    return
  }
  func.func @transform_0(%arg0: i32) -> (i32, i32) {
    %c0_i32 = arith.constant 0 : i32
    %c0_i32_0 = arith.constant 0 : i32
    return %arg0, %c0_i32 : i32, i32
  }
  func.func @transform_1(%arg0: i32) -> (i32, i32) {
    %c0_i32 = arith.constant 0 : i32
    %c0_i32_0 = arith.constant 0 : i32
    %c0_i32_1 = arith.constant 0 : i32
    return %c0_i32, %c0_i32_0 : i32, i32
  }
  func.func @transform_2(%arg0: i32) -> (i32, i32) {
    %c0_i32 = arith.constant 0 : i32
    %c0_i32_0 = arith.constant 0 : i32
    %c0_i32_1 = arith.constant 0 : i32
    return %c0_i32, %c0_i32_0 : i32, i32
  }
  func.func @transform_3(%arg0: i32) -> (i32, i32) {
    %c0_i32 = arith.constant 0 : i32
    %c0_i32_0 = arith.constant 0 : i32
    %c0_i32_1 = arith.constant 0 : i32
    return %c0_i32, %c0_i32_0 : i32, i32
  }
  func.func @transform_4(%arg0: i32) -> (i32, i32) {
    %c0_i32 = arith.constant 0 : i32
    %c0_i32_0 = arith.constant 0 : i32
    %c0_i32_1 = arith.constant 0 : i32
    return %c0_i32, %c0_i32_0 : i32, i32
  }
  func.func @transform_5(%arg0: i32) -> (i32, i32) {
    %c0_i32 = arith.constant 0 : i32
    %c0_i32_0 = arith.constant 0 : i32
    %c0_i32_1 = arith.constant 0 : i32
    return %c0_i32, %c0_i32_0 : i32, i32
  }
  func.func @transform_6(%arg0: i32) -> (i32, i32) {
    %c0_i32 = arith.constant 0 : i32
    %c0_i32_0 = arith.constant 0 : i32
    %c0_i32_1 = arith.constant 0 : i32
    return %c0_i32, %c0_i32_0 : i32, i32
  }
  func.func @transform_7(%arg0: i32) -> (i32, i32) {
    %c0_i32 = arith.constant 0 : i32
    %c0_i32_0 = arith.constant 0 : i32
    %c0_i32_1 = arith.constant 0 : i32
    return %c0_i32, %c0_i32_0 : i32, i32
  }
  func.func @transform_8(%arg0: i32) -> (i32, i32) {
    %c0_i32 = arith.constant 0 : i32
    %c0_i32_0 = arith.constant 0 : i32
    %c0_i32_1 = arith.constant 0 : i32
    return %c0_i32, %c0_i32_0 : i32, i32
  }
  func.func @transform_9(%arg0: i32) -> (i32, i32) {
    %c0_i32 = arith.constant 0 : i32
    %c0_i32_0 = arith.constant 0 : i32
    return %arg0, %c0_i32 : i32, i32
  }
}

</mosaic_0001>

<bundles_post_ra>
// kernel: hand_gesture_forward.1
= control target key start
LH: loop header
LB: loop body
LE: loop exit
PB: predicated region body
PF: predicated region fallthrough
CT: control target
= control target key end

     0   :  { %14 = vsyncpa [#allocation3], 0  ;;  %s1090_s0 = inlined_call_operand.hbm [shape: f32[8,63], index: 0, kind: input, shape index: {}]   ;;  %s1091_s1 = inlined_call_operand.hbm [shape: bf16[63,256], index: 1, kind: input, shape index: {}]   ;;  %s1092_s2 = inlined_call_operand.vmem [shape: f32[1,256], index: 2, kind: input, shape index: {}]   ;;  %s1093_s3 = inlined_call_operand.hbm [shape: bf16[256,128], index: 3, kind: input, shape index: {}]   ;;  %s1094_s4 = inlined_call_operand.vmem [shape: f32[1,128], index: 4, kind: input, shape index: {}]   ;;  %s1095_s5 = inlined_call_operand.hbm [shape: bf16[128,128], index: 5, kind: input, shape index: {}]   ;;  %s1096_s6 = inlined_call_operand.vmem [shape: f32[1,128], index: 6, kind: input, shape index: {}]   ;;  %s1097_s7 = inlined_call_operand.hbm [shape: bf16[128,128], index: 7, kind: input, shape index: {}]   ;;  %s1098_s8 = inlined_call_operand.vmem [shape: f32[1,128], index: 8, kind: input, shape index: {}]   ;;  %s1099_s9 = inlined_call_operand.vmem [shape: bf16[8,128], index: 9, kind: output, shape index: {}]  }
   0x1   :  { %15 = vsyncpa [#allocation5], 0 }
   0x2   :  { %16 = vsyncpa [#allocation8], 0  ;;  %s925_s30 = smov [#allocation4]   ;;  %s809_s13 = scalar_lea.hbm %s1091_s1, 1024 }
   0x3   :  { %s32_s10 = sshll.u32 %s925_s30, 4  ;;  %p810_p0 = scmp.ne.s32.totalorder %s1091_s1, %s809_s13  ;;  %s33_s10 = int_to_ptr.vmem [resolvable:$true] %s32_s10 }
   0x4   :  { %p813_p1 = scmp.lt.u32.totalorder %s809_s13, %s1091_s1 }
   0x6   :  { %p815_p2 = pnand %p813_p1, %p810_p0 }
   0x8   :  { %818 = shalt.err (!%p815_p2)
}
   0x9   :  { %s819_s18 = scalar_lea.vmem %s33_s10, 1024  ;;  %p824_p4 = scmp.lt.s32.totalorder %s33_s10, %s33_s10 }
   0xa   :  { %p820_p3 = scmp.ne.s32.totalorder %s33_s10, %s819_s18  ;;  %p825_p5 = scmp.lt.s32.totalorder %s819_s18, %s819_s18 }
   0xc   :  { %p826_p6 = por %p825_p5, %p824_p4 }
   0xe   :  { %p827_p7 = pnand %p826_p6, %p820_p3 }
  0x10   :  { %830 = shalt.err (!%p827_p7)
}
  0x11   :  { %s926_s19 = smov 128   ;;  %s927_s20 = smov 8  }
  0x12   :  { %38 = dma.hbm_to_vmem [thread:$0]  %s1091_s1, 1024, %s33_s10, [#allocation5], %s926_s19, %s926_s19, %s927_s20  }
  0x13   :  { %s928_s23 = smov [#allocation7]   ;;  %s929_s25 = smov [#allocation2]  }
  0x14   :  { %s60_s24 = sshll.u32 %s928_s23, 4  ;;  %s23_s26 = sshll.u32 %s929_s25, 4  ;;  %s61_s24 = int_to_ptr.vmem [resolvable:$true] %s60_s24  ;;  %s24_s26 = int_to_ptr.vmem [resolvable:$true] %s23_s26 }
  0x15   :  { %s831_s29 = scalar_lea.hbm %s1095_s5, 1024 }
  0x16   :  { %p832_p8 = scmp.ne.s32.totalorder %s1095_s5, %s831_s29  ;;  %p835_p9 = scmp.lt.u32.totalorder %s831_s29, %s1095_s5 }
  0x18   :  { %p837_p10 = pnand %p835_p9, %p832_p8 }
  0x1a   :  { %840 = shalt.err (!%p837_p10)
}
  0x1b   :  { %s841_s1 = scalar_lea.vmem %s61_s24, 1024  ;;  %p846_p12 = scmp.lt.s32.totalorder %s61_s24, %s61_s24 }
  0x1c   :  { %p842_p11 = scmp.ne.s32.totalorder %s61_s24, %s841_s1  ;;  %p847_p13 = scmp.lt.s32.totalorder %s841_s1, %s841_s1 }
  0x1e   :  { %p848_p0 = por %p847_p13, %p846_p12 }
  0x20   :  { %p849_p1 = pnand %p848_p0, %p842_p11 }
  0x22   :  { %852 = shalt.err (!%p849_p1)
}
  0x23   :  { %s930_s10 = smov 64   ;;  %s931_s14 = smov 4  }
  0x24   :  { %66 = dma.hbm_to_vmem [thread:$0]  %s1095_s5, 1024, %s61_s24, [#allocation8], %s930_s10, %s930_s10, %s931_s14  }
  0x25   :  { %s853_s19 = scalar_lea.hbm %s1090_s0, 128 }
  0x26   :  { %p854_p2 = scmp.ne.s32.totalorder %s1090_s0, %s853_s19  ;;  %p857_p3 = scmp.lt.u32.totalorder %s853_s19, %s1090_s0 }
  0x28   :  { %p859_p4 = pnand %p857_p3, %p854_p2 }
  0x2a   :  { %862 = shalt.err (!%p859_p4)
}
  0x2b   :  { %s863_s25 = scalar_lea.vmem %s24_s26, 128  ;;  %p868_p6 = scmp.lt.s32.totalorder %s24_s26, %s24_s26 }
  0x2c   :  { %p864_p5 = scmp.ne.s32.totalorder %s24_s26, %s863_s25  ;;  %p869_p7 = scmp.lt.s32.totalorder %s863_s25, %s863_s25 }
  0x2e   :  { %p870_p8 = por %p869_p7, %p868_p6 }
  0x30   :  { %p871_p9 = pnand %p870_p8, %p864_p5 }
  0x32   :  { %874 = shalt.err (!%p871_p9)
}
  0x33   :  { %26 = dma.hbm_to_vmem [thread:$0]  %s1090_s0, 128, %s24_s26, [#allocation3]  }
  0x34   :  { %s932_s27 = smov [#allocation6]   ;;  %s933_s29 = smov [#allocation9]  }
  0x35   :  { %s46_s28 = sshll.u32 %s932_s27, 4  ;;  %s74_s30 = sshll.u32 %s933_s29, 4  ;;  %s47_s28 = int_to_ptr.vmem [resolvable:$true] %s46_s28  ;;  %s75_s30 = int_to_ptr.vmem [resolvable:$true] %s74_s30 }
  0x36   :  { %s875_s13 = scalar_lea.hbm %s1093_s3, 2048 }
  0x37   :  { %p876_p10 = scmp.ne.s32.totalorder %s1093_s3, %s875_s13  ;;  %p879_p11 = scmp.lt.u32.totalorder %s875_s13, %s1093_s3 }
  0x39   :  { %p881_p12 = pnand %p879_p11, %p876_p10 }
  0x3b   :  { %884 = shalt.err (!%p881_p12)
}
  0x3c   :  { %s885_s0 = scalar_lea.vmem %s47_s28, 2048  ;;  %p890_p0 = scmp.lt.s32.totalorder %s47_s28, %s47_s28 }
  0x3d   :  { %p886_p13 = scmp.ne.s32.totalorder %s47_s28, %s885_s0  ;;  %p891_p1 = scmp.lt.s32.totalorder %s885_s0, %s885_s0 }
  0x3f   :  { %p892_p2 = por %p891_p1, %p890_p0 }
  0x41   :  { %p893_p3 = pnand %p892_p2, %p886_p13 }
  0x43   :  { %896 = shalt.err (!%p893_p3)
}
  0x44   :  { %52 = dma.hbm_to_vmem [thread:$0]  %s1093_s3, 2048, %s47_s28, [#allocation5], %s930_s10, %s930_s10, %s931_s14  }
  0x45   :  { %s897_s21 = scalar_lea.hbm %s1097_s7, 1024 }
  0x46   :  { %p898_p4 = scmp.ne.s32.totalorder %s1097_s7, %s897_s21  ;;  %p901_p5 = scmp.lt.u32.totalorder %s897_s21, %s1097_s7 }
  0x48   :  { %p903_p6 = pnand %p901_p5, %p898_p4 }
  0x4a   :  { %906 = shalt.err (!%p903_p6)
}
  0x4b   :  { %s907_s24 = scalar_lea.vmem %s75_s30, 1024  ;;  %p912_p8 = scmp.lt.s32.totalorder %s75_s30, %s75_s30 }
  0x4c   :  { %p908_p7 = scmp.ne.s32.totalorder %s75_s30, %s907_s24  ;;  %p913_p9 = scmp.lt.s32.totalorder %s907_s24, %s907_s24 }
  0x4e   :  { %p914_p10 = por %p913_p9, %p912_p8 }
  0x50   :  { %p915_p11 = pnand %p914_p10, %p908_p7 }
  0x52   :  { %918 = shalt.err (!%p915_p11)
}
  0x53   :  { %80 = dma.hbm_to_vmem [thread:$0]  %s1097_s7, 1024, %s75_s30, [#allocation8], %s930_s10, %s930_s10, %s931_s14  }
  0x54   :  { %919 = dma.done.wait [#allocation3], 128  }
  0x55   :  { %920 = vsyncadd [#allocation3], 4294967168 }
  0x56   :  { %921 = dma.done.wait [#allocation5], 3072  }
  0x57   :  { %922 = vsyncadd [#allocation5], 4294964224 }
  0x58   :  { %923 = dma.done.wait [#allocation8], 2048  }
  0x59   :  { %924 = vsyncadd [#allocation8], 4294965248  ;;  %v934_v0 = vmov 0   ;;  %vm163_vm0 = vcmask 1046528   ;;  %v765_v1 = vld [vmem:[#allocation4 + $0x4] ss:$8 sps:$4 sm:$0xff]   ;;  %v111_v39 = vlaneseq }
  0x5a   :  { %205 = vmatprep.mubr.bf16.mxu0 %v934_v0  ;;  %v767_v2 = vld [vmem:[#allocation4] ss:$8 sps:$4 sm:$0xff]   ;;  %vm164_vm1 = vcmask 1047552   ;;  %v935_v3 = vmov 65535   ;;  %173 = vmatprep.subr.bf16.mxu0 %v765_v1  ;;  %v768_v5 = vld [vmem:[#allocation4 + $0x14] ss:$8 sps:$4 sm:$0xff]  }
  0x5b   :  { %v165_v4 = vsel %vm163_vm0, 4294967295, %v935_v3  ;;  %174 = vmatpush1.bf16.msra.mxu0 %v767_v2  ;;  %v770_v6 = vld [vmem:[#allocation4 + $0x10] ss:$8 sps:$4 sm:$0xff]   ;;  %v771_v7 = vld [vmem:[#allocation4 + $0x24] ss:$8 sps:$4 sm:$0xff]   ;;  %vm159_vm2 = vcmask 515072  }
  0x5c   :  { %175 = vmatprep.subr.bf16.mxu0 %v768_v5  ;;  %v774_v8 = vld [vmem:[#allocation4 + $0x34] ss:$8 sps:$4 sm:$0xff]   ;;  %v166_v9 = vsel %vm164_vm1, %v165_v4, 0  ;;  %v773_v10 = vld [vmem:[#allocation4 + $0x20] ss:$8 sps:$4 sm:$0xff]   ;;  %v936_v33 = vmov 0.0  }
  0x5d   :  { %v776_v11 = vld [vmem:[#allocation4 + $0x30] ss:$8 sps:$4 sm:$0xff]   ;;  %v777_v12 = vld [vmem:[#allocation6 + $0x40] sm:$0xff]   ;;  %v171_v14 = vand.u32 %v774_v8, %v166_v9  ;;  %v779_v15 = vld [vmem:[#allocation6 + $0x48] sm:$0xff]   ;;  %v112_v40 = vshrl.u32 %v111_v39, 7  ;;  %vm937_vm3 = vmmov 0  }
  0x5e   :  { %v778_v13 = vld [vmem:[#allocation6] sm:$0xff]   ;;  %672 = vmatprep.subr.bf16.mxu1 %v777_v12  ;;  %v780_v16 = vld [vmem:[#allocation6 + $0x8] sm:$0xff]   ;;  %v781_v17 = vld [vmem:[#allocation6 + $0x50] sm:$0xff]   ;;  %v168_v18 = vand.u32 %v776_v11, %v166_v9 }
  0x5f   :  { %176 = vmatpush1.bf16.msra.mxu0 %v770_v6  ;;  %673 = vmatpush3.bf16.msra.mxu1 %v778_v13  ;;  %v99_v19 = vld [vmem:[#allocation2] sm:$0xff]  ;;  %v782_v20 = vld [vmem:[#allocation6 + $0x10] sm:$0xff]   ;;  %v785_v24 = vld [vmem:[#allocation6 + $0x60] sm:$0xff]   ;;  %v113_v41 = vsub.s32 0, %v112_v40  ;;  %v117_v43 = vsub.s32 1, %v112_v40 }
  0x60   :  { %177 = vmatprep.subr.bf16.mxu0 %v771_v7  ;;  %674 = vmatprep.subr.bf16.mxu1 %v779_v15  ;;  %v100_v21 = vpack.c.bf16 %v99_v19, %v99_v19  ;;  %v783_v22 = vld [vmem:[#allocation6 + $0x58] sm:$0xff]   ;;  %v786_v25 = vld [vmem:[#allocation6 + $0x20] sm:$0xff]   ;;  %v787_v26 = vld [vmem:[#allocation6 + $0x68] sm:$0xff]  }
  0x61   :  { %v784_v23 = vld [vmem:[#allocation6 + $0x18] sm:$0xff]   ;;  %v788_v27 = vld [vmem:[#allocation6 + $0x28] sm:$0xff]   ;;  %v789_v28 = vld [vmem:[#allocation6 + $0x70] sm:$0xff]  }
  0x62   :  { %v790_v29 = vld [vmem:[#allocation6 + $0x30] sm:$0xff]   ;;  %v791_v30 = vld [vmem:[#allocation6 + $0x78] sm:$0xff]   ;;  %v793_v32 = vld [vmem:[#allocation7] sm:$0xff]  }
  0x63   :  { %178 = vmatpush1.bf16.msra.mxu0 %v773_v10  ;;  %675 = vmatpush3.bf16.msra.mxu1 %v780_v16  ;;  %v792_v31 = vld [vmem:[#allocation6 + $0x38] sm:$0xff]   ;;  %v794_v34 = vld [vmem:[#allocation7 + $0x8] sm:$0xff]   ;;  %v795_v35 = vld [vmem:[#allocation7 + $0x10] sm:$0xff]  }
  0x64   :  { %179 = vmatprep.subr.bf16.mxu0 %v171_v14  ;;  %676 = vmatprep.subr.bf16.mxu1 %v781_v17  ;;  %v796_v36 = vld [vmem:[#allocation7 + $0x18] sm:$0xff]   ;;  %v797_v37 = vld [vmem:[#allocation7 + $0x20] sm:$0xff]   ;;  %v798_v38 = vld [vmem:[#allocation7 + $0x28] sm:$0xff]  }
  0x65   :  { %v109_v42 = vld [vmem:[%s1092_s2] sm:$0x3]  ;;  %v800_v57 = vld [vmem:[#allocation7 + $0x38] sm:$0xff]   ;;  %v801_v58 = vld [vmem:[#allocation9] sm:$0xff]  }
  0x66   :  { %v114_v44 = vrot.slane %v109_v42, %v113_v41  ;;  %v118_v45 = vrot.slane %v109_v42, %v117_v43  ;;  %v799_v56 = vld [vmem:[#allocation7 + $0x30] sm:$0xff]   ;;  %v802_v59 = vld [vmem:[#allocation9 + $0x8] sm:$0xff]   ;;  %v804_v61 = vld [vmem:[#allocation9 + $0x18] sm:$0xff]  }
  0x67   :  { %180 = vmatpush1.bf16.msra.mxu0 %v168_v18  ;;  %677 = vmatpush3.bf16.msra.mxu1 %v782_v20  ;;  %v803_v60 = vld [vmem:[#allocation9 + $0x10] sm:$0xff]   ;;  %v805_v62 = vld [vmem:[#allocation9 + $0x20] sm:$0xff]   ;;  %v806_v63 = vld [vmem:[#allocation9 + $0x28] sm:$0xff]  }
  0x68   :  { %678 = vmatprep.subr.bf16.mxu1 %v783_v22  ;;  %712 = vmatprep.subr.bf16.mxu0 %v936_v33  ;;  %v637_v1 = vld [vmem:[%s1094_s4] ss:$0 sm:$0xff]  ;;  %v808_v10 = vld [vmem:[#allocation9 + $0x38] sm:$0xff]  }
  0x69   :  { %v807_v9 = vld [vmem:[#allocation9 + $0x30] sm:$0xff]  }
  0x6a   :  { %636 = vmatmul.mubr.msk.bf16.vlgmr.msra.gmra.mrb[0].mxu0 %vm159_vm2, %v100_v21  ;;  %v654_v11 = vld [vmem:[%s1096_s6] ss:$0 sm:$0xff] }
  0x6b   :  { %679 = vmatpush3.bf16.msra.mxu1 %v784_v23  ;;  %713 = vmatpush3.bf16.msra.mxu0 %v793_v32  ;;  %v663_v19 = vld [vmem:[%s1098_s8] ss:$0 sm:$0xff] }
  0x6c   :  { %680 = vmatprep.subr.bf16.mxu1 %v785_v24  ;;  %714 = vmatprep.subr.bf16.mxu0 %v936_v33 }
  0x6d   :  { %728 = vmatprep.mubr.msk.bf16.mxu0 %vm937_vm3, %v936_v33 }
  0x6f   :  { %681 = vmatpush3.bf16.msra.mxu1 %v786_v25  ;;  %715 = vmatpush3.bf16.msra.mxu0 %v794_v34 }
  0x70   :  { %682 = vmatprep.subr.bf16.mxu1 %v787_v26  ;;  %716 = vmatprep.subr.bf16.mxu0 %v936_v33 }
  0x73   :  { %683 = vmatpush3.bf16.msra.mxu1 %v788_v27  ;;  %717 = vmatpush3.bf16.msra.mxu0 %v795_v35 }
  0x74   :  { %684 = vmatprep.subr.bf16.mxu1 %v789_v28  ;;  %718 = vmatprep.subr.bf16.mxu0 %v936_v33 }
  0x77   :  { %685 = vmatpush3.bf16.msra.mxu1 %v790_v29  ;;  %719 = vmatpush3.bf16.msra.mxu0 %v796_v36 }
  0x78   :  { %686 = vmatprep.subr.bf16.mxu1 %v791_v30  ;;  %720 = vmatprep.subr.bf16.mxu0 %v936_v33 }
  0x7b   :  { %687 = vmatpush3.bf16.msra.mxu1 %v792_v31  ;;  %721 = vmatpush3.bf16.msra.mxu0 %v797_v37 }
  0x7c   :  { %732 = vmatprep.subr.bf16.mxu1 %v936_v33  ;;  %722 = vmatprep.subr.bf16.mxu0 %v936_v33 }
  0x7f   :  { %723 = vmatpush3.bf16.msra.mxu0 %v798_v38 }
  0x80   :  { %724 = vmatprep.subr.bf16.mxu0 %v936_v33 }
  0x83   :  { %725 = vmatpush3.bf16.msra.mxu0 %v799_v56 }
  0x84   :  { %726 = vmatprep.subr.bf16.mxu0 %v936_v33 }
  0x87   :  { %727 = vmatpush3.bf16.msra.mxu0 %v800_v57 }
 0x13d   :  { %v207_v46 = vpop.f32.mrb[0].mxu0 }
 0x13e   :  { %v208_v47 = vadd.f32 %v207_v46, %v114_v44  ;;  %v209_v48 = vpop.f32.mrb[1].mxu0 }
 0x13f   :  { %v210_v49 = vadd.f32 %v209_v48, %v118_v45  ;;  %v211_v50 = vpop.f32.mrb[2].mxu0 }
 0x140   :  { %v214_v51 = vmax.f32 %v208_v47, 0.0  ;;  %v212_v52 = vpop.f32.mrb[3].mxu0 }
 0x141   :  { %v215_v53 = vmax.f32 %v210_v49, 0.0 }
 0x142   :  { %v216_v55 = vpack.c.bf16 %v214_v51, %v214_v51 }
 0x143   :  { %v217_v54 = vpack.c.bf16 %v215_v53, %v215_v53 }
 0x145   :  { %385 = vmatprep.mubr.bf16.mxu1 %v217_v54 }
 0x146   :  { %386 = vmatmul.mubr.bf16.vlgmr.msra.gmra.mrb[0].mxu1 %v216_v55 }
 0x147   :  { %748 = vmatprep.mubr.msk.bf16.mxu1 %vm937_vm3, %v936_v33  ;;  %733 = vmatpush3.bf16.msra.mxu1 %v801_v58 }
 0x148   :  { %734 = vmatprep.subr.bf16.mxu1 %v936_v33 }
 0x14b   :  { %735 = vmatpush3.bf16.msra.mxu1 %v802_v59 }
 0x14c   :  { %736 = vmatprep.subr.bf16.mxu1 %v936_v33 }
 0x14f   :  { %737 = vmatpush3.bf16.msra.mxu1 %v803_v60 }
 0x150   :  { %738 = vmatprep.subr.bf16.mxu1 %v936_v33 }
 0x153   :  { %739 = vmatpush3.bf16.msra.mxu1 %v804_v61 }
 0x154   :  { %740 = vmatprep.subr.bf16.mxu1 %v936_v33 }
 0x157   :  { %741 = vmatpush3.bf16.msra.mxu1 %v805_v62 }
 0x158   :  { %742 = vmatprep.subr.bf16.mxu1 %v936_v33 }
 0x15b   :  { %743 = vmatpush3.bf16.msra.mxu1 %v806_v63 }
 0x15c   :  { %744 = vmatprep.subr.bf16.mxu1 %v936_v33 }
 0x15f   :  { %745 = vmatpush3.bf16.msra.mxu1 %v807_v9 }
 0x160   :  { %746 = vmatprep.subr.bf16.mxu1 %v936_v33 }
 0x163   :  { %747 = vmatpush3.bf16.msra.mxu1 %v808_v10 }
 0x219   :  { %v688_v0 = vpop.f32.mrb[0].mxu1 }
 0x21a   :  { %v689_v2 = vpop.f32.mrb[1].mxu1 }
 0x21b   :  { %v690_v3 = vadd.f32 %v689_v2, %v688_v0  ;;  %v691_v4 = vpop.f32.mrb[2].mxu1 }
 0x21c   :  { %v692_v5 = vpop.f32.mrb[3].mxu1 }
 0x21d   :  { %v388_v6 = vadd.f32 %v690_v3, %v637_v1 }
 0x21f   :  { %v393_v7 = vmax.f32 %v388_v6, 0.0 }
 0x221   :  { %v394_v8 = vpack.c.bf16 %v393_v7, %v393_v7 }
 0x223   :  { %729 = vmatmul.mubr.bf16.vlgmr.msra.gmra.mrb[4].mxu0 %v394_v8 }
 0x2f6   :  { %v500_v12 = vpop.f32.mrb[4].mxu0 }
 0x2f7   :  { %v501_v13 = vadd.f32 %v654_v11, %v500_v12  ;;  %v730_v14 = vpop.f32.mrb[5].mxu0 }
 0x2f8   :  { %v503_v15 = vpop.f32.mrb[6].mxu0 }
 0x2f9   :  { %v506_v16 = vmax.f32 %v501_v13, 0.0  ;;  %v731_v17 = vpop.f32.mrb[7].mxu0 }
 0x2fb   :  { %v507_v18 = vpack.c.bf16 %v506_v16, %v506_v16 }
 0x2fd   :  { %749 = vmatmul.mubr.bf16.vlgmr.msra.gmra.mrb[4].mxu1 %v507_v18 }
 0x3d0   :  { %v613_v20 = vpop.f32.mrb[4].mxu1 }
 0x3d1   :  { %v614_v21 = vadd.f32 %v663_v19, %v613_v20  ;;  %v750_v22 = vpop.f32.mrb[5].mxu1 }
 0x3d2   :  { %v616_v23 = vpop.f32.mrb[6].mxu1 }
 0x3d3   :  { %v619_v24 = vpack.c.bf16 %v614_v21, %v614_v21  ;;  %v751_v25 = vpop.f32.mrb[7].mxu1 }
 0x3d5   :  { %620 = vst [vmem:[%s1099_s9] sm:$0xf] %v619_v24 }
 0x3d6   :  { %625 = vsyncpa [#allocation3], 1 }
 0x3d7   :  { %626 = vsyncpa [#allocation5], 1 }
 0x3d8   :  { %627 = vsyncpa [#allocation8], 1 }

</bundles_post_ra>
